<compile_context>
chip_gen: v6e
topology: v6e:2x2x1
jax: 0.10.0
libtpu: 0.0.40
codegen_flags: <defaults>
</compile_context>

<pallas_src>
import functools

import jax
import jax.numpy as jnp
from jax.experimental import pallas as pl
from jax.experimental.pallas import tpu as pltpu

LANE = 128          # TPU lane width; output/action dim is padded to this.
NEG_BIG = -1e30     # finite "-inf" for padded action lanes (exp underflows to 0).


def policy_net_kernel(x_ref, w1_ref, b1_ref, w2_ref, b2_ref, out_ref):
    # fc1 + ReLU   (x: (TILE_B, S), w1: (S, H), b1: (1, H))
    h = jnp.dot(x_ref[...], w1_ref[...], preferred_element_type=jnp.float32)
    h = jnp.maximum(h + b1_ref[...], 0.0)
    # fc2          (w2: (H, A_pad), b2: (1, A_pad); pad lanes of b2 are -1e30)
    logits = jnp.dot(h, w2_ref[...], preferred_element_type=jnp.float32)
    logits = logits + b2_ref[...]
    # softmax along the action axis, numerically stable; pad lanes -> exp == 0.
    m = jnp.max(logits, axis=1, keepdims=True)
    e = jnp.exp(logits - m)
    denom = jnp.sum(e, axis=1, keepdims=True)
    inv = pl.reciprocal(denom, approx=False)  # exact; keeps row sums == 1
    out_ref[...] = (e * inv).astype(out_ref.dtype)


def _round_up(n, m):
    return ((n + m - 1) // m) * m


@functools.partial(jax.jit, static_argnames=("tile_b",))
def policy_net_forward(x, w1, b1, w2, b2, *, tile_b=512):
    """x: (B, state_dim); w1: (state_dim, hidden); b1: (1, hidden);
       w2: (hidden, action_num); b2: (1, action_num).
       Returns (B, action_num) action probabilities (softmax over dim=1)."""
    B, S = x.shape
    H, A = w2.shape

    # ---- lane-dense action dim: pad A -> multiple of 128 --------------------
    A_pad = _round_up(max(A, LANE), LANE)
    w2p = jnp.zeros((H, A_pad), jnp.float32).at[:, :A].set(w2.astype(jnp.float32))
    b2p = jnp.full((1, A_pad), NEG_BIG, jnp.float32).at[:, :A].set(b2.astype(jnp.float32))

    # ---- batch tiling -------------------------------------------------------
    tile_b = max(8, min(int(tile_b), _round_up(B, 8)))
    tile_b = _round_up(tile_b, 8)
    nb = pl.cdiv(B, tile_b)
    B_pad = nb * tile_b
    if B_pad != B:
        x = jnp.pad(x, ((0, B_pad - B), (0, 0)))

    x = x.astype(jnp.float32)
    w1 = w1.astype(jnp.float32)
    b1 = b1.astype(jnp.float32)

    grid_spec = pltpu.PrefetchScalarGridSpec(
        num_scalar_prefetch=0,
        grid=(nb,),
        in_specs=[
            pl.BlockSpec((tile_b, S), lambda i: (i, 0)),   # x: tiled over batch
            pl.BlockSpec((S, H), lambda i: (0, 0)),        # w1: VMEM-resident
            pl.BlockSpec((1, H), lambda i: (0, 0)),        # b1: VMEM-resident
            pl.BlockSpec((H, A_pad), lambda i: (0, 0)),    # w2 (padded): resident
            pl.BlockSpec((1, A_pad), lambda i: (0, 0)),    # b2 (padded): resident
        ],
        out_specs=pl.BlockSpec((tile_b, A_pad), lambda i: (i, 0)),
    )

    out = pl.pallas_call(
        policy_net_kernel,
        out_shape=jax.ShapeDtypeStruct((B_pad, A_pad), jnp.float32),
        grid_spec=grid_spec,
        compiler_params=pltpu.CompilerParams(
            dimension_semantics=("parallel",),   # batch tiles -> both TCs on v7x
            vmem_limit_bytes=32 * 1024 * 1024,   # generous headroom, fits v7x 64 MiB
        ),
    )(x, w1, b1, w2p, b2p)

    # Slice padded batch rows / padded action lanes back off.
    return out[:B, :A]


def init_params(key, state_dim, action_num, hidden_dim):
    """Deterministic init mimicking nn.Linear default (uniform +/- 1/sqrt(fan_in)).
       Weights stored already transposed: (in_features, out_features)."""
    k1, k2, k3, k4 = jax.random.split(key, 4)
    bound1 = 1.0 / jnp.sqrt(state_dim)
    bound2 = 1.0 / jnp.sqrt(hidden_dim)
    w1 = jax.random.uniform(k1, (state_dim, hidden_dim), jnp.float32, -bound1, bound1)
    b1 = jax.random.uniform(k2, (1, hidden_dim), jnp.float32, -bound1, bound1)
    w2 = jax.random.uniform(k3, (hidden_dim, action_num), jnp.float32, -bound2, bound2)
    b2 = jax.random.uniform(k4, (1, action_num), jnp.float32, -bound2, bound2)
    return w1, b1, w2, b2


if __name__ == "__main__":
    # Small shapes consistent with the module (LunarLander-like policy net),
    # but with enough batch rows to exercise a multi-step batch grid.
    batch, state_dim, action_num, hidden_dim = 256, 8, 4, 32
    tile_b = 128  # -> grid of 2 batch tiles

    key = jax.random.PRNGKey(0)
    kx, kp = jax.random.split(key)
    x = jax.random.normal(kx, (batch, state_dim), jnp.float32)
    w1, b1, w2, b2 = init_params(kp, state_dim, action_num, hidden_dim)

    probs = policy_net_forward(x, w1, b1, w2, b2, tile_b=tile_b)
    jax.block_until_ready(probs)

    # Pure-JAX reference check of forward-pass semantics.
    h_ref = jnp.maximum(x @ w1 + b1, 0.0)
    logits_ref = h_ref @ w2 + b2
    probs_ref = jax.nn.softmax(logits_ref, axis=1)
    assert probs.shape == (batch, action_num)
    assert jnp.allclose(probs, probs_ref, atol=1e-5, rtol=1e-5)
    assert jnp.allclose(jnp.sum(probs, axis=1), 1.0, atol=1e-5)

    # Also check the non-multiple-of-tile batch path.
    probs_small = policy_net_forward(x[:13], w1, b1, w2, b2, tile_b=tile_b)
    jax.block_until_ready(probs_small)
    assert jnp.allclose(probs_small, probs_ref[:13], atol=1e-5, rtol=1e-5)

    print("KERNEL_OK")
</pallas_src>

<mosaic_0001>
module attributes {stable_mosaic.version = 11 : i64} {
  func.func @policy_net_kernel(%arg0: i32, %arg1: memref<128x8xf32, #tpu.memory_space<vmem>>, %arg2: memref<8x32xf32, #tpu.memory_space<vmem>>, %arg3: memref<1x32xf32, #tpu.memory_space<vmem>>, %arg4: memref<32x128xf32, #tpu.memory_space<vmem>>, %arg5: memref<1x128xf32, #tpu.memory_space<vmem>>, %arg6: memref<128x128xf32, #tpu.memory_space<vmem>>) attributes {dimension_semantics = [#tpu.dimension_semantics<parallel>], iteration_bounds = array<i64: 2>, scalar_prefetch = 0 : i64, scratch_operands = 0 : i64, tpu.core_type = #tpu.core_type<tc>, window_params = [{transform_indices = @transform_0, window_bounds = array<i64: 128, 8>}, {pipeline_mode = #tpu.pipeline_mode<synchronous>, transform_indices = @transform_1, window_bounds = array<i64: 8, 32>}, {pipeline_mode = #tpu.pipeline_mode<synchronous>, transform_indices = @transform_2, window_bounds = array<i64: 1, 32>}, {pipeline_mode = #tpu.pipeline_mode<synchronous>, transform_indices = @transform_3, window_bounds = array<i64: 32, 128>}, {pipeline_mode = #tpu.pipeline_mode<synchronous>, transform_indices = @transform_4, window_bounds = array<i64: 1, 128>}, {transform_indices = @transform_5, window_bounds = array<i64: 128, 128>}]} {
    %c0 = arith.constant 0 : index
    %c0_0 = arith.constant 0 : index
    %0 = vector.load %arg1[%c0, %c0_0] : memref<128x8xf32, #tpu.memory_space<vmem>>, vector<128x8xf32>
    %c0_1 = arith.constant 0 : index
    %c0_2 = arith.constant 0 : index
    %1 = vector.load %arg2[%c0_1, %c0_2] : memref<8x32xf32, #tpu.memory_space<vmem>>, vector<8x32xf32>
    %cst = arith.constant dense<0.000000e+00> : vector<128x32xf32>
    %2 = tpu.matmul %0, %1, %cst {dimension_numbers = #tpu.dot_dimension_numbers<[1], [0], [0], [1], [0, 0, 1, 1], [], []>} : vector<128x8xf32>, vector<8x32xf32>, vector<128x32xf32> -> vector<128x32xf32>
    %c0_3 = arith.constant 0 : index
    %c0_4 = arith.constant 0 : index
    %3 = vector.load %arg3[%c0_3, %c0_4] : memref<1x32xf32, #tpu.memory_space<vmem>>, vector<1x32xf32>
    %4 = vector.broadcast %3 : vector<1x32xf32> to vector<128x32xf32>
    %5 = arith.addf %2, %4 : vector<128x32xf32>
    %cst_5 = arith.constant 0.000000e+00 : f32
    %6 = vector.broadcast %cst_5 : f32 to vector<128x32xf32>
    %7 = arith.maximumf %5, %6 : vector<128x32xf32>
    %c0_6 = arith.constant 0 : index
    %c0_7 = arith.constant 0 : index
    %8 = vector.load %arg4[%c0_6, %c0_7] : memref<32x128xf32, #tpu.memory_space<vmem>>, vector<32x128xf32>
    %cst_8 = arith.constant dense<0.000000e+00> : vector<128x128xf32>
    %9 = tpu.matmul %7, %8, %cst_8 {dimension_numbers = #tpu.dot_dimension_numbers<[1], [0], [0], [1], [0, 0, 1, 1], [], []>} : vector<128x32xf32>, vector<32x128xf32>, vector<128x128xf32> -> vector<128x128xf32>
    %c0_9 = arith.constant 0 : index
    %c0_10 = arith.constant 0 : index
    %10 = vector.load %arg5[%c0_9, %c0_10] : memref<1x128xf32, #tpu.memory_space<vmem>>, vector<1x128xf32>
    %11 = vector.broadcast %10 : vector<1x128xf32> to vector<128x128xf32>
    %12 = arith.addf %9, %11 : vector<128x128xf32>
    %cst_11 = arith.constant dense<0xFF800000> : vector<128xf32>
    %13 = vector.multi_reduction <maximumf>, %12, %cst_11 [1] : vector<128x128xf32> to vector<128xf32>
    %14 = vector.shape_cast %13 : vector<128xf32> to vector<128x1xf32>
    %15 = vector.broadcast %14 : vector<128x1xf32> to vector<128x128xf32>
    %16 = arith.subf %12, %15 : vector<128x128xf32>
    %17 = math.exp %16 : vector<128x128xf32>
    %cst_12 = arith.constant dense<0.000000e+00> : vector<128xf32>
    %18 = vector.multi_reduction <add>, %17, %cst_12 [1] : vector<128x128xf32> to vector<128xf32>
    %19 = vector.shape_cast %18 : vector<128xf32> to vector<128x1xf32>
    %20 = tpu.reciprocal %19 : vector<128x1xf32> -> vector<128x1xf32>
    %21 = vector.broadcast %20 : vector<128x1xf32> to vector<128x128xf32>
    %22 = arith.mulf %17, %21 : vector<128x128xf32>
    %c0_13 = arith.constant 0 : index
    %c0_14 = arith.constant 0 : index
    %23 = vector.load %arg6[%c0_13, %c0_14] : memref<128x128xf32, #tpu.memory_space<vmem>>, vector<128x128xf32>
    tpu.vector_store %arg6[%c0_13, %c0_14], %22 {strides = array<i32>} : memref<128x128xf32, #tpu.memory_space<vmem>>, vector<128x128xf32>,
    return
  }
  func.func @transform_0(%arg0: i32) -> (i32, i32) {
    %c0_i32 = arith.constant 0 : i32
    %c0_i32_0 = arith.constant 0 : i32
    return %arg0, %c0_i32 : i32, i32
  }
  func.func @transform_1(%arg0: i32) -> (i32, i32) {
    %c0_i32 = arith.constant 0 : i32
    %c0_i32_0 = arith.constant 0 : i32
    %c0_i32_1 = arith.constant 0 : i32
    return %c0_i32, %c0_i32_0 : i32, i32
  }
  func.func @transform_2(%arg0: i32) -> (i32, i32) {
    %c0_i32 = arith.constant 0 : i32
    %c0_i32_0 = arith.constant 0 : i32
    %c0_i32_1 = arith.constant 0 : i32
    return %c0_i32, %c0_i32_0 : i32, i32
  }
  func.func @transform_3(%arg0: i32) -> (i32, i32) {
    %c0_i32 = arith.constant 0 : i32
    %c0_i32_0 = arith.constant 0 : i32
    %c0_i32_1 = arith.constant 0 : i32
    return %c0_i32, %c0_i32_0 : i32, i32
  }
  func.func @transform_4(%arg0: i32) -> (i32, i32) {
    %c0_i32 = arith.constant 0 : i32
    %c0_i32_0 = arith.constant 0 : i32
    %c0_i32_1 = arith.constant 0 : i32
    return %c0_i32, %c0_i32_0 : i32, i32
  }
  func.func @transform_5(%arg0: i32) -> (i32, i32) {
    %c0_i32 = arith.constant 0 : i32
    %c0_i32_0 = arith.constant 0 : i32
    return %arg0, %c0_i32 : i32, i32
  }
}

</mosaic_0001>

<bundles_post_ra>
// kernel: policy_net_forward.1
= control target key start
LH: loop header
LB: loop body
LE: loop exit
PB: predicated region body
PF: predicated region fallthrough
CT: control target
= control target key end

     0   :  { %s1133_s18 = smov 0   ;;  %s1334_s0 = inlined_call_operand.vmem [shape: f32[256,8], index: 0, kind: input, shape index: {}]   ;;  %s1335_s1 = inlined_call_operand.vmem [shape: f32[8,32], index: 1, kind: input, shape index: {}]   ;;  %s1336_s2 = inlined_call_operand.vmem [shape: f32[1,32], index: 2, kind: input, shape index: {}]   ;;  %s1337_s3 = inlined_call_operand.vmem [shape: f32[32,128], index: 3, kind: input, shape index: {}]   ;;  %s1338_s4 = inlined_call_operand.vmem [shape: f32[1,128], index: 4, kind: input, shape index: {}]   ;;  %s1339_s5 = inlined_call_operand.vmem [shape: f32[256,128], index: 5, kind: output, shape index: {}]  }
   0x1 LB: > { %s883_s19 = sadd.s32 4294967295, %s1101_s18   ;;  %p887_p0 = scmp.ge.s32.totalorder %s1101_s18, 1  ;;  %s1101_s18 = sphi %s1133_s18, %s15_s18  }
   0x2   : > { %p188_p1 = scmp.lt.s32.totalorder %s1101_s18, 3 }
   0x4   : > { %p189_p2 = pnand %p887_p0, %p188_p1 }
   0x5   : > { %s888_s22 = sshll.u32 (!%p189_p2), %s883_s19, 4 }
   0x6   : > { %192 = sbr.rel (%p189_p2) target bundleno = 755 (0x2f3), region = 40  ;;  %p217_p3 = scmp.lt.s32.totalorder (!%p189_p2), %s888_s22, 31 }
   0xb   : > { %v244_v0 = vld [vmem:[%s1335_s1] sm:$0xff]  ;;  %s1341_s22 = smov (!%p217_p3, %s888_s22), 31  ;;  %vm252_vm0 = vcmask 64512   ;;  %v465_v17 = vld [vmem:[%s1337_s3 + $0x18] sm:$0xff]  ;;  %v464_v18 = vld [vmem:[%s1337_s3 + $0x10] sm:$0xff]  ;;  %vm473_vm1 = vcmask 261120  }
   0xc   : > { %965 = vmatprep.subr.mxu0 %v244_v0  ;;  %s889_s23 = sshll.u32 %s1341_s22, 3  ;;  %991 = vmatprep.subr.mxu1 %v465_v17  ;;  %v463_v19 = vld [vmem:[%s1337_s3 + $0x8] sm:$0xff]  ;;  %v462_v20 = vld [vmem:[%s1337_s3] sm:$0xff] }
   0xd   : > { %966 = vmatpush3.msra.mxu0 %v244_v0  ;;  %s1152_s26 = scalar_lea.vmem %s1334_s0, %s889_s23  ;;  %992 = vmatpush3.msra.mxu1 %v465_v17  ;;  %v892_v21 = vld [vmem:[%s1336_s2] ss:$0 sm:$0xff]  ;;  %s1297_s16 = scalar_lea.vmem %s1339_s5, %s889_s23 }
   0xe   : > { %v228_v1 = vld [vmem:[%s1152_s26] sm:$0xff]  ;;  %v229_v2 = vld [vmem:[%s1152_s26 + $0x8] sm:$0xff]  ;;  %v230_v3 = vld [vmem:[%s1152_s26 + $0x10] sm:$0xff]  ;;  %993 = vmatprep.subr.mxu1 %v464_v18 }
   0xf   : > { %967 = vmatprep.mubr.msk.f32.mxu0 %vm252_vm0, %v228_v1  ;;  %v231_v4 = vld [vmem:[%s1152_s26 + $0x18] sm:$0xff]  ;;  %v232_v5 = vld [vmem:[%s1152_s26 + $0x20] sm:$0xff]  ;;  %v233_v6 = vld [vmem:[%s1152_s26 + $0x28] sm:$0xff]  ;;  %994 = vmatpush3.msra.mxu1 %v464_v18 }
  0x10   : > { %968 = vmatmul.mubr.msk.f32.vlgmr.msra.gmra.mxu0 %vm252_vm0, %v229_v2  ;;  %v234_v7 = vld [vmem:[%s1152_s26 + $0x30] sm:$0xff]  ;;  %v235_v8 = vld [vmem:[%s1152_s26 + $0x38] sm:$0xff]  ;;  %v236_v9 = vld [vmem:[%s1152_s26 + $0x40] sm:$0xff]  ;;  %995 = vmatprep.subr.mxu1 %v463_v19 }
  0x11   : > { %970 = vmatprep.mubr.msk.f32.mxu0 %vm252_vm0, %v230_v3  ;;  %v237_v10 = vld [vmem:[%s1152_s26 + $0x48] sm:$0xff]  ;;  %v238_v11 = vld [vmem:[%s1152_s26 + $0x50] sm:$0xff]  ;;  %v239_v12 = vld [vmem:[%s1152_s26 + $0x58] sm:$0xff]  ;;  %996 = vmatpush3.msra.mxu1 %v463_v19 }
  0x12   : > { %v240_v13 = vld [vmem:[%s1152_s26 + $0x60] sm:$0xff]  ;;  %v241_v14 = vld [vmem:[%s1152_s26 + $0x68] sm:$0xff]  ;;  %v242_v15 = vld [vmem:[%s1152_s26 + $0x70] sm:$0xff]  ;;  %997 = vmatprep.subr.mxu1 %v462_v20 }
  0x13   : > { %v243_v16 = vld [vmem:[%s1152_s26 + $0x78] sm:$0xff]  ;;  %998 = vmatpush3.msra.mxu1 %v462_v20 }
  0x14   : > { %971 = vmatmul.mubr.msk.f32.gmra.mxu0 %vm252_vm0, %v231_v4 }
  0x15   : > { %973 = vmatprep.mubr.msk.f32.mxu0 %vm252_vm0, %v232_v5 }
  0x18   : > { %974 = vmatmul.mubr.msk.f32.gmra.mxu0 %vm252_vm0, %v233_v6  ;;  %v909_v6 = vld [vmem:[%s1338_s4] ss:$0 sm:$0xff] }
  0x19   : > { %976 = vmatprep.mubr.msk.f32.mxu0 %vm252_vm0, %v234_v7 }
  0x1c   : > { %977 = vmatmul.mubr.msk.f32.gmra.mxu0 %vm252_vm0, %v235_v8 }
  0x1d   : > { %979 = vmatprep.mubr.msk.f32.mxu0 %vm252_vm0, %v236_v9 }
  0x20   : > { %980 = vmatmul.mubr.msk.f32.gmra.mxu0 %vm252_vm0, %v237_v10 }
  0x21   : > { %982 = vmatprep.mubr.msk.f32.mxu0 %vm252_vm0, %v238_v11 }
  0x24   : > { %983 = vmatmul.mubr.msk.f32.gmra.mxu0 %vm252_vm0, %v239_v12 }
  0x25   : > { %985 = vmatprep.mubr.msk.f32.mxu0 %vm252_vm0, %v240_v13 }
  0x28   : > { %986 = vmatmul.mubr.msk.f32.gmra.mxu0 %vm252_vm0, %v241_v14 }
  0x29   : > { %988 = vmatprep.mubr.msk.f32.mxu0 %vm252_vm0, %v242_v15 }
  0x2c   : > { %989 = vmatmul.mubr.msk.f32.gmra.mxu0 %vm252_vm0, %v243_v16 }
  0xd0   : > { %v969_v22 = vpop.f32.mrf.mxu0 }
  0xd1   : > { %v373_v23 = vadd.f32 %v969_v22, %v892_v21 }
  0xd2   : > { %v367_v24 = vpop.f32.mrf.mxu0 }
  0xd3   : > { %v368_v25 = vadd.f32 %v892_v21, %v367_v24  ;;  %v447_v28 = vmax.f32 %v373_v23, 0.0 }
  0xd4   : > { %v972_v26 = vpop.f32.mrf.mxu0 }
  0xd5   : > { %v446_v27 = vmax.f32 %v368_v25, 0.0  ;;  %v383_v29 = vadd.f32 %v972_v26, %v892_v21 }
  0xd6   : > { %v377_v30 = vpop.f32.mrf.mxu0 }
  0xd7   : > { %v378_v31 = vadd.f32 %v892_v21, %v377_v30  ;;  %999 = vmatprep.mubr.msk.f32.mxu1 %vm473_vm1, %v446_v27  ;;  %v449_v35 = vmax.f32 %v383_v29, 0.0 }
  0xd8   : > { %v975_v32 = vpop.f32.mrf.mxu0  ;;  %1000 = vmatmul.mubr.msk.f32.vlgmr.msra.gmra.mxu1 %vm473_vm1, %v447_v28 }
  0xd9   : > { %v448_v33 = vmax.f32 %v378_v31, 0.0  ;;  %v393_v34 = vadd.f32 %v975_v32, %v892_v21 }
  0xda   : > { %v387_v36 = vpop.f32.mrf.mxu0 }
  0xdb   : > { %v388_v37 = vadd.f32 %v892_v21, %v387_v36  ;;  %1002 = vmatprep.mubr.msk.f32.mxu1 %vm473_vm1, %v448_v33  ;;  %v451_v38 = vmax.f32 %v393_v34, 0.0 }
  0xdc   : > { %v978_v39 = vpop.f32.mrf.mxu0  ;;  %1003 = vmatmul.mubr.msk.f32.gmra.mxu1 %vm473_vm1, %v449_v35 }
  0xdd   : > { %v450_v40 = vmax.f32 %v388_v37, 0.0  ;;  %v403_v41 = vadd.f32 %v978_v39, %v892_v21 }
  0xde   : > { %v397_v42 = vpop.f32.mrf.mxu0 }
  0xdf   : > { %v398_v43 = vadd.f32 %v892_v21, %v397_v42  ;;  %1005 = vmatprep.mubr.msk.f32.mxu1 %vm473_vm1, %v450_v40  ;;  %v453_v44 = vmax.f32 %v403_v41, 0.0 }
  0xe0   : > { %v981_v45 = vpop.f32.mrf.mxu0  ;;  %1006 = vmatmul.mubr.msk.f32.gmra.mxu1 %vm473_vm1, %v451_v38 }
  0xe1   : > { %v452_v46 = vmax.f32 %v398_v43, 0.0  ;;  %v413_v47 = vadd.f32 %v981_v45, %v892_v21 }
  0xe2   : > { %v407_v48 = vpop.f32.mrf.mxu0 }
  0xe3   : > { %v408_v49 = vadd.f32 %v892_v21, %v407_v48  ;;  %1008 = vmatprep.mubr.msk.f32.mxu1 %vm473_vm1, %v452_v46  ;;  %v455_v50 = vmax.f32 %v413_v47, 0.0 }
  0xe4   : > { %v984_v51 = vpop.f32.mrf.mxu0  ;;  %1009 = vmatmul.mubr.msk.f32.gmra.mxu1 %vm473_vm1, %v453_v44 }
  0xe5   : > { %v454_v52 = vmax.f32 %v408_v49, 0.0  ;;  %v423_v53 = vadd.f32 %v984_v51, %v892_v21 }
  0xe6   : > { %v417_v54 = vpop.f32.mrf.mxu0 }
  0xe7   : > { %v418_v55 = vadd.f32 %v892_v21, %v417_v54  ;;  %1011 = vmatprep.mubr.msk.f32.mxu1 %vm473_vm1, %v454_v52  ;;  %v457_v56 = vmax.f32 %v423_v53, 0.0 }
  0xe8   : > { %v987_v57 = vpop.f32.mrf.mxu0  ;;  %1012 = vmatmul.mubr.msk.f32.gmra.mxu1 %vm473_vm1, %v455_v50 }
  0xe9   : > { %v456_v58 = vmax.f32 %v418_v55, 0.0  ;;  %v433_v59 = vadd.f32 %v987_v57, %v892_v21 }
  0xea   : > { %v427_v60 = vpop.f32.mrf.mxu0 }
  0xeb   : > { %v428_v61 = vadd.f32 %v892_v21, %v427_v60  ;;  %1014 = vmatprep.mubr.msk.f32.mxu1 %vm473_vm1, %v456_v58  ;;  %v459_v62 = vmax.f32 %v433_v59, 0.0 }
  0xec   : > { %v990_v63 = vpop.f32.mrf.mxu0  ;;  %1015 = vmatmul.mubr.msk.f32.gmra.mxu1 %vm473_vm1, %v457_v56 }
  0xed   : > { %v458_v0 = vmax.f32 %v428_v61, 0.0  ;;  %v443_v1 = vadd.f32 %v990_v63, %v892_v21 }
  0xee   : > { %v437_v2 = vpop.f32.mrf.mxu0 }
  0xef   : > { %v438_v3 = vadd.f32 %v892_v21, %v437_v2  ;;  %1017 = vmatprep.mubr.msk.f32.mxu1 %vm473_vm1, %v458_v0  ;;  %v461_v4 = vmax.f32 %v443_v1, 0.0 }
  0xf0   : > { %1018 = vmatmul.mubr.msk.f32.gmra.mxu1 %vm473_vm1, %v459_v62 }
  0xf1   : > { %v460_v5 = vmax.f32 %v438_v3, 0.0 }
  0xf3   : > { %1020 = vmatprep.mubr.msk.f32.mxu1 %vm473_vm1, %v460_v5 }
  0xf4   : > { %1021 = vmatmul.mubr.msk.f32.gmra.mxu1 %vm473_vm1, %v461_v4 }
 0x198   : > { %v1001_v7 = vpop.f32.mrf.mxu1 }
 0x199   : > { %v594_v8 = vadd.f32 %v1001_v7, %v909_v6 }
 0x19a   : > { %v588_v9 = vpop.f32.mrf.mxu1 }
 0x19b   : > { %669 = vmax.xlane.f32.xlu0 %v594_v8  ;;  %v589_v11 = vadd.f32 %v909_v6, %v588_v9 }
 0x19c   : > { %v1004_v10 = vpop.f32.mrf.mxu1 }
 0x19d   : > { %v604_v12 = vadd.f32 %v1004_v10, %v909_v6 }
 0x19e   : > { %v598_v13 = vpop.f32.mrf.mxu1 }
 0x19f   : > { %673 = vmax.xlane.f32.xlu1 %v604_v12  ;;  %667 = vmax.xlane.f32.xlu0 %v589_v11  ;;  %v599_v15 = vadd.f32 %v909_v6, %v598_v13 }
 0x1a0   : > { %v1007_v14 = vpop.f32.mrf.mxu1 }
 0x1a1   : > { %v614_v19 = vadd.f32 %v1007_v14, %v909_v6 }
 0x1a2   : > { %v608_v16 = vpop.f32.mrf.mxu1 }
 0x1a3   : > { %v609_v17 = vadd.f32 %v909_v6, %v608_v16  ;;  %671 = vmax.xlane.f32.xlu1 %v599_v15 }
 0x1a4   : > { %v1010_v18 = vpop.f32.mrf.mxu1 }
 0x1a5   : > { %675 = vmax.xlane.f32.xlu0 %v609_v17  ;;  %v624_v23 = vadd.f32 %v1010_v18, %v909_v6 }
 0x1a6   : > { %v618_v20 = vpop.f32.mrf.mxu1 }
 0x1a7   : > { %v619_v21 = vadd.f32 %v909_v6, %v618_v20  ;;  %677 = vmax.xlane.f32.xlu1 %v614_v19 }
 0x1a8   : > { %v1013_v22 = vpop.f32.mrf.mxu1 }
 0x1a9   : > { %679 = vmax.xlane.f32.xlu0 %v619_v21  ;;  %v634_v27 = vadd.f32 %v1013_v22, %v909_v6 }
 0x1aa   : > { %v628_v24 = vpop.f32.mrf.mxu1 }
 0x1ab   : > { %v629_v25 = vadd.f32 %v909_v6, %v628_v24  ;;  %681 = vmax.xlane.f32.xlu1 %v624_v23 }
 0x1ac   : > { %v1016_v26 = vpop.f32.mrf.mxu1 }
 0x1ad   : > { %683 = vmax.xlane.f32.xlu0 %v629_v25  ;;  %v1222_v31 = vadd.f32 %v1016_v26, %v909_v6 }
 0x1ae   : > { %v638_v28 = vpop.f32.mrf.mxu1 }
 0x1af   : > { %v1220_v29 = vadd.f32 %v909_v6, %v638_v28  ;;  %685 = vmax.xlane.f32.xlu1 %v634_v27 }
 0x1b0   : > { %v1019_v30 = vpop.f32.mrf.mxu1 }
 0x1b1   : > { %687 = vmax.xlane.f32.xlu0 %v1220_v29  ;;  %v1228_v35 = vadd.f32 %v1019_v30, %v909_v6 }
 0x1b2   : > { %v648_v32 = vpop.f32.mrf.mxu1 }
 0x1b3   : > { %v1225_v33 = vadd.f32 %v909_v6, %v648_v32  ;;  %689 = vmax.xlane.f32.xlu1 %v1222_v31 }
 0x1b4   : > { %v1022_v34 = vpop.f32.mrf.mxu1 }
 0x1b5   : > { %691 = vmax.xlane.f32.xlu0 %v1225_v33  ;;  %v1234_v38 = vadd.f32 %v1022_v34, %v909_v6 }
 0x1b6   : > { %v658_v36 = vpop.f32.mrf.mxu1 }
 0x1b7   : > { %v1231_v37 = vadd.f32 %v909_v6, %v658_v36  ;;  %693 = vmax.xlane.f32.xlu1 %v1228_v35 }
 0x1b9   : > { %695 = vmax.xlane.f32.xlu0 %v1231_v37 }
 0x1bb   : > { %697 = vmax.xlane.f32.xlu1 %v1234_v38 }
 0x224   : > { %v670_v39 = vpop.xlane.xlu0 %669 }
 0x225   : > { %v700_v40 = vsub.f32 %v594_v8, %v670_v39 }
 0x227   : > { %v717_v41 = vmul.f32 1.442695, %v700_v40 }
 0x228   : > { %v674_v42 = vpop.xlane.xlu1 %673  ;;  %v668_v43 = vpop.xlane.xlu0 %667 }
 0x229   : > { %1031 = vpow2.f32 %v717_v41  ;;  %v702_v44 = vsub.f32 %v604_v12, %v674_v42  ;;  %v699_v45 = vsub.f32 %v589_v11, %v668_v43 }
 0x22b   : > { %v721_v46 = vmul.f32 1.442695, %v702_v44  ;;  %v715_v47 = vmul.f32 1.442695, %v699_v45 }
 0x22c   : > { %v672_v48 = vpop.xlane.xlu1 %671 }
 0x22d   : > { %1033 = vpow2.f32 %v721_v46  ;;  %v701_v49 = vsub.f32 %v599_v15, %v672_v48 }
 0x22e   : > { %1035 = vpow2.f32 %v715_v47  ;;  %v676_v50 = vpop.xlane.xlu0 %675 }
 0x22f   : > { %v719_v51 = vmul.f32 1.442695, %v701_v49  ;;  %v703_v52 = vsub.f32 %v609_v17, %v676_v50 }
 0x230   : > { %v678_v53 = vpop.xlane.xlu1 %677 }
 0x231   : > { %1037 = vpow2.f32 %v719_v51  ;;  %v704_v54 = vsub.f32 %v614_v19, %v678_v53  ;;  %v723_v55 = vmul.f32 1.442695, %v703_v52 }
 0x232   : > { %v680_v56 = vpop.xlane.xlu0 %679 }
 0x233   : > { %v725_v57 = vmul.f32 1.442695, %v704_v54  ;;  %v705_v58 = vsub.f32 %v619_v21, %v680_v56 }
 0x234   : > { %v682_v59 = vpop.xlane.xlu1 %681 }
 0x235   : > { %1039 = vpow2.f32 %v725_v57  ;;  %v706_v60 = vsub.f32 %v624_v23, %v682_v59  ;;  %v727_v62 = vmul.f32 1.442695, %v705_v58 }
 0x236   : > { %v1238_v61 = vpop.eup %1031  ;;  %1041 = vpow2.f32 %v723_v55  ;;  %v684_v63 = vpop.xlane.xlu0 %683 }
 0x237   : > { %v729_v0 = vmul.f32 1.442695, %v706_v60  ;;  %v707_v1 = vsub.f32 %v629_v25, %v684_v63  ;;  %749 = vadd.xlane.f32.xlu1 %v1238_v61 }
 0x238   : > { %v686_v2 = vpop.xlane.xlu1 %685 }
 0x239   : > { %1043 = vpow2.f32 %v729_v0  ;;  %v708_v3 = vsub.f32 %v634_v27, %v686_v2  ;;  %v731_v5 = vmul.f32 1.442695, %v707_v1 }
 0x23a   : > { %v1241_v4 = vpop.eup %1033  ;;  %1045 = vpow2.f32 %v727_v62  ;;  %v688_v6 = vpop.xlane.xlu0 %687 }
 0x23b   : > { %v1243_v7 = vpop.eup %1035  ;;  %v733_v8 = vmul.f32 1.442695, %v708_v3  ;;  %v709_v9 = vsub.f32 %v1220_v29, %v688_v6  ;;  %753 = vadd.xlane.f32.xlu1 %v1241_v4 }
 0x23c   : > { %747 = vadd.xlane.f32.xlu0 %v1243_v7  ;;  %v690_v10 = vpop.xlane.xlu1 %689 }
 0x23d   : > { %1047 = vpow2.f32 %v733_v8  ;;  %v710_v11 = vsub.f32 %v1222_v31, %v690_v10  ;;  %v735_v13 = vmul.f32 1.442695, %v709_v9 }
 0x23e   : > { %v1249_v12 = vpop.eup %1037  ;;  %1049 = vpow2.f32 %v731_v5  ;;  %v692_v14 = vpop.xlane.xlu0 %691 }
 0x23f   : > { %v737_v15 = vmul.f32 1.442695, %v710_v11  ;;  %v711_v16 = vsub.f32 %v1225_v33, %v692_v14 }
 0x240   : > { %751 = vadd.xlane.f32.xlu0 %v1249_v12  ;;  %v694_v17 = vpop.xlane.xlu1 %693 }
 0x241   : > { %1051 = vpow2.f32 %v737_v15  ;;  %v712_v18 = vsub.f32 %v1228_v35, %v694_v17  ;;  %v739_v20 = vmul.f32 1.442695, %v711_v16 }
 0x242   : > { %v1254_v19 = vpop.eup %1039  ;;  %1053 = vpow2.f32 %v735_v13  ;;  %v696_v21 = vpop.xlane.xlu0 %695 }
 0x243   : > { %v1256_v22 = vpop.eup %1041  ;;  %v741_v23 = vmul.f32 1.442695, %v712_v18  ;;  %v713_v24 = vsub.f32 %v1231_v37, %v696_v21  ;;  %757 = vadd.xlane.f32.xlu1 %v1254_v19 }
 0x244   : > { %755 = vadd.xlane.f32.xlu0 %v1256_v22  ;;  %v698_v25 = vpop.xlane.xlu1 %697 }
 0x245   : > { %1055 = vpow2.f32 %v741_v23  ;;  %v714_v26 = vsub.f32 %v1234_v38, %v698_v25  ;;  %v743_v28 = vmul.f32 1.442695, %v713_v24 }
 0x246   : > { %v1262_v27 = vpop.eup %1043  ;;  %1057 = vpow2.f32 %v739_v20 }
 0x247   : > { %v1264_v29 = vpop.eup %1045  ;;  %v745_v30 = vmul.f32 1.442695, %v714_v26  ;;  %761 = vadd.xlane.f32.xlu1 %v1262_v27 }
 0x248   : > { %759 = vadd.xlane.f32.xlu0 %v1264_v29 }
 0x249   : > { %1059 = vpow2.f32 %v745_v30 }
 0x24a   : > { %v1268_v31 = vpop.eup %1047  ;;  %1061 = vpow2.f32 %v743_v28 }
 0x24b   : > { %v1270_v32 = vpop.eup %1049  ;;  %765 = vadd.xlane.f32.xlu1 %v1268_v31 }
 0x24c   : > { %763 = vadd.xlane.f32.xlu0 %v1270_v32 }
 0x24e   : > { %v1274_v33 = vpop.eup %1051 }
 0x24f   : > { %v1276_v34 = vpop.eup %1053  ;;  %769 = vadd.xlane.f32.xlu1 %v1274_v33 }
 0x250   : > { %767 = vadd.xlane.f32.xlu0 %v1276_v34 }
 0x252   : > { %v1280_v35 = vpop.eup %1055 }
 0x253   : > { %v1282_v36 = vpop.eup %1057  ;;  %773 = vadd.xlane.f32.xlu1 %v1280_v35 }
 0x254   : > { %771 = vadd.xlane.f32.xlu0 %v1282_v36 }
 0x256   : > { %v1286_v37 = vpop.eup %1059 }
 0x257   : > { %v1288_v38 = vpop.eup %1061  ;;  %777 = vadd.xlane.f32.xlu1 %v1286_v37 }
 0x258   : > { %775 = vadd.xlane.f32.xlu0 %v1288_v38 }
 0x2c0   : > { %v750_v39 = vpop.xlane.xlu1 %749 }
 0x2c1   : > { %1063 = vrcp.f32 %v750_v39 }
 0x2c4   : > { %v754_v40 = vpop.xlane.xlu1 %753 }
 0x2c5   : > { %1065 = vrcp.f32 %v754_v40  ;;  %v748_v41 = vpop.xlane.xlu0 %747 }
 0x2c6   : > { %1067 = vrcp.f32 %v748_v41 }
 0x2c9   : > { %v752_v42 = vpop.xlane.xlu0 %751 }
 0x2ca   : > { %1069 = vrcp.f32 %v752_v42 }
 0x2cc   : > { %v758_v43 = vpop.xlane.xlu1 %757 }
 0x2cd   : > { %1071 = vrcp.f32 %v758_v43  ;;  %v756_v44 = vpop.xlane.xlu0 %755 }
 0x2ce   : > { %v1064_v45 = vpop.eup %1063  ;;  %1073 = vrcp.f32 %v756_v44 }
 0x2cf   : > { %v796_v46 = vmul.f32 %v1064_v45, %v1238_v61 }
 0x2d0   : > { %v762_v47 = vpop.xlane.xlu1 %761 }
 0x2d1   : > { %812 = vst [vmem:[%s1297_s16 + $0x8] sm:$0xff] %v796_v46  ;;  %1075 = vrcp.f32 %v762_v47  ;;  %v760_v48 = vpop.xlane.xlu0 %759 }
 0x2d2   : > { %v1066_v49 = vpop.eup %1065  ;;  %1077 = vrcp.f32 %v760_v48 }
 0x2d3   : > { %v1068_v50 = vpop.eup %1067  ;;  %v798_v51 = vmul.f32 %v1066_v49, %v1241_v4 }
 0x2d4   : > { %v795_v52 = vmul.f32 %v1068_v50, %v1243_v7  ;;  %v766_v53 = vpop.xlane.xlu1 %765 }
 0x2d5   : > { %814 = vst [vmem:[%s1297_s16 + $0x18] sm:$0xff] %v798_v51  ;;  %1079 = vrcp.f32 %v766_v53  ;;  %v764_v54 = vpop.xlane.xlu0 %763 }
 0x2d6   : > { %811 = vst [vmem:[%s1297_s16] sm:$0xff] %v795_v52  ;;  %1081 = vrcp.f32 %v764_v54 }
 0x2d7   : > { %v1070_v55 = vpop.eup %1069 }
 0x2d8   : > { %v797_v56 = vmul.f32 %v1070_v55, %v1249_v12  ;;  %v770_v57 = vpop.xlane.xlu1 %769 }
 0x2d9   : > { %1083 = vrcp.f32 %v770_v57  ;;  %v768_v58 = vpop.xlane.xlu0 %767 }
 0x2da   : > { %v1072_v59 = vpop.eup %1071  ;;  %813 = vst [vmem:[%s1297_s16 + $0x10] sm:$0xff] %v797_v56  ;;  %1085 = vrcp.f32 %v768_v58 }
 0x2db   : > { %v1074_v60 = vpop.eup %1073  ;;  %v800_v61 = vmul.f32 %v1072_v59, %v1254_v19 }
 0x2dc   : > { %v799_v62 = vmul.f32 %v1074_v60, %v1256_v22  ;;  %v774_v63 = vpop.xlane.xlu1 %773 }
 0x2dd   : > { %816 = vst [vmem:[%s1297_s16 + $0x28] sm:$0xff] %v800_v61  ;;  %1087 = vrcp.f32 %v774_v63  ;;  %v772_v0 = vpop.xlane.xlu0 %771 }
 0x2de   : > { %v1076_v1 = vpop.eup %1075  ;;  %815 = vst [vmem:[%s1297_s16 + $0x20] sm:$0xff] %v799_v62  ;;  %1089 = vrcp.f32 %v772_v0 }
 0x2df   : > { %v1078_v2 = vpop.eup %1077  ;;  %v802_v3 = vmul.f32 %v1076_v1, %v1262_v27 }
 0x2e0   : > { %v801_v4 = vmul.f32 %v1078_v2, %v1264_v29  ;;  %v778_v5 = vpop.xlane.xlu1 %777 }
 0x2e1   : > { %818 = vst [vmem:[%s1297_s16 + $0x38] sm:$0xff] %v802_v3  ;;  %1091 = vrcp.f32 %v778_v5  ;;  %v776_v6 = vpop.xlane.xlu0 %775 }
 0x2e2   : > { %v1080_v7 = vpop.eup %1079  ;;  %817 = vst [vmem:[%s1297_s16 + $0x30] sm:$0xff] %v801_v4  ;;  %1093 = vrcp.f32 %v776_v6 }
 0x2e3   : > { %v1082_v8 = vpop.eup %1081  ;;  %v804_v9 = vmul.f32 %v1080_v7, %v1268_v31 }
 0x2e4   : > { %v803_v10 = vmul.f32 %v1082_v8, %v1270_v32 }
 0x2e5   : > { %820 = vst [vmem:[%s1297_s16 + $0x48] sm:$0xff] %v804_v9 }
 0x2e6   : > { %v1084_v11 = vpop.eup %1083  ;;  %819 = vst [vmem:[%s1297_s16 + $0x40] sm:$0xff] %v803_v10 }
 0x2e7   : > { %v1086_v12 = vpop.eup %1085  ;;  %v806_v13 = vmul.f32 %v1084_v11, %v1274_v33 }
 0x2e8   : > { %v805_v14 = vmul.f32 %v1086_v12, %v1276_v34 }
 0x2e9   : > { %822 = vst [vmem:[%s1297_s16 + $0x58] sm:$0xff] %v806_v13 }
 0x2ea   : > { %v1088_v15 = vpop.eup %1087  ;;  %821 = vst [vmem:[%s1297_s16 + $0x50] sm:$0xff] %v805_v14 }
 0x2eb   : > { %v1090_v16 = vpop.eup %1089  ;;  %v808_v17 = vmul.f32 %v1088_v15, %v1280_v35 }
 0x2ec   : > { %v807_v18 = vmul.f32 %v1090_v16, %v1282_v36 }
 0x2ed   : > { %824 = vst [vmem:[%s1297_s16 + $0x68] sm:$0xff] %v808_v17 }
 0x2ee   : > { %v1092_v19 = vpop.eup %1091  ;;  %823 = vst [vmem:[%s1297_s16 + $0x60] sm:$0xff] %v807_v18 }
 0x2ef   : > { %v1094_v20 = vpop.eup %1093  ;;  %v810_v21 = vmul.f32 %v1092_v19, %v1286_v37 }
 0x2f0   : > { %v809_v22 = vmul.f32 %v1094_v20, %v1288_v38 }
 0x2f1   : > { %826 = vst [vmem:[%s1297_s16 + $0x78] sm:$0xff] %v810_v21 }
 0x2f2   : > { %825 = vst [vmem:[%s1297_s16 + $0x70] sm:$0xff] %v809_v22 }
 0x2f3 PF: > { %s15_s18 = sadd.s32 1, %s1101_s18  }
 0x2f4   : > { %p12_p4 = scmp.ge.s32.totalorder %s15_s18, 4  }
 0x2f6   :  { %14 = sbr.rel (!%p12_p4) target bundleno = 1 (0x1), region = 70 }

</bundles_post_ra>
